<compile_context>
chip_gen: v7x
topology: tpu7x:2x2x1
jax: 0.10.0
libtpu: 0.0.40
codegen_flags: <defaults>
</compile_context>

<pallas_src>
import jax
import jax.numpy as jnp
from jax.experimental import pallas as pl
from jax.experimental.pallas import tpu as pltpu

HIDDEN = 40      # nn.Linear(1, 40) / nn.Linear(40, 40)
PAD_OUT = 128    # layer-2 output rows zero-padded 40 -> 128 so the in-kernel
                 # transpose is tile-aligned on both sides
CHUNK = 2048     # lane sub-chunk: (PAD_OUT, CHUNK) f32 intermediates ~1 MiB
_MAX_TILE = 16384  # VMEM cap for the double-buffered, lane-padded out block


def _feature_kernel(x_ref, w1_ref, b1_ref, w2p_ref, b2p_ref, o_ref):
    # x_ref  : (1, T)        one batch tile, batch along lanes (lane-dense DMA)
    # w1_ref : (40, 1)       PyTorch (out, in) = (40, 1)
    # b1_ref : (40, 1)
    # w2p_ref: (128, 40)     PyTorch (out, in) layout, out rows zero-padded 40->128
    # b2p_ref: (128, 1)      zero-padded
    # o_ref  : (T, 40)       row-major output block, written chunk-wise
    t = x_ref.shape[1]
    start = 0
    while start < t:                      # static (fully unrolled) chunk loop
        c = min(CHUNK, t - start)         # always a multiple of 128
        xc = x_ref[:, pl.ds(start, c)]                                   # (1, c)
        # Layer 1: K=1 outer product -> VPU broadcast multiply, MXU stays free.
        h = jnp.maximum(w1_ref[...] * xc + b1_ref[...], 0.0)            # (40, c)
        # Layer 2 on the MXU with f32 accumulation (rows 40..127 are zero pad).
        o = jnp.dot(w2p_ref[...], h, preferred_element_type=jnp.float32)  # (128, c)
        o = jnp.maximum(o + b2p_ref[...], 0.0)                           # (128, c)
        # Tile-aligned XLU transpose to row-major, keep only the 40 real rows.
        ot = jnp.transpose(o)                                            # (c, 128)
        o_ref[pl.ds(start, c), :] = ot[:, :HIDDEN].astype(o_ref.dtype)   # (c, 40)
        start += c


def _choose_tile(n, tile_n):
    """Pick a 128-multiple batch tile: large (amortize per-step overhead),
    VMEM-capped, and giving >=2 grid steps when the batch allows (megacore)."""
    tile_n = max(128, min(int(tile_n), _MAX_TILE))
    tile_n = (tile_n // 128) * 128
    n128 = ((n + 127) // 128) * 128
    tile = min(tile_n, n128)
    if n128 >= 256:
        half = ((n128 // 2) // 128) * 128
        tile = min(tile, max(128, half))
    return max(128, tile)


def feature_forward(x, w1, b1, w2, b2, *, tile_n=8192):
    """Forward pass of `Feature`.

    x : (N, 1) float32
    w1: (40, 1)  b1: (40,)   -- PyTorch nn.Linear(1, 40) layout
    w2: (40, 40) b2: (40,)   -- PyTorch nn.Linear(40, 40) layout
    Returns (N, 40) float32.
    """
    n = x.shape[0]

    # Lane-dense layout: batch on the lane (last) axis.  Pure reshape, no copy.
    x_t = x.reshape(1, n)

    tile = _choose_tile(n, tile_n)
    n_pad = ((n + tile - 1) // tile) * tile
    if n_pad != n:
        # Tiny (4*n_pad bytes) pad of x; padded columns are sliced off below.
        x_t = jnp.pad(x_t, ((0, 0), (0, n_pad - n)))
    grid = (n_pad // tile,)

    # Parameter plumbing (host/XLA side, trivial): column biases + padded W2/b2.
    b1c = b1.reshape(HIDDEN, 1)
    w2p = jnp.pad(w2, ((0, PAD_OUT - HIDDEN), (0, 0)))
    b2p = jnp.pad(b2.reshape(HIDDEN, 1), ((0, PAD_OUT - HIDDEN), (0, 0)))

    cost = pl.CostEstimate(
        flops=2 * n_pad * HIDDEN * (PAD_OUT + 1),
        transcendentals=0,
        bytes_accessed=4 * (n_pad * (1 + HIDDEN)
                            + HIDDEN * (1 + 1 + PAD_OUT) + PAD_OUT),
    )

    out = pl.pallas_call(
        _feature_kernel,
        out_shape=jax.ShapeDtypeStruct((n_pad, HIDDEN), jnp.float32),
        grid=grid,
        in_specs=[
            pl.BlockSpec((1, tile), lambda i: (0, i)),            # x^T tile (lane-dense)
            pl.BlockSpec((HIDDEN, 1), lambda i: (0, 0)),          # w1 -> VMEM-resident
            pl.BlockSpec((HIDDEN, 1), lambda i: (0, 0)),          # b1
            pl.BlockSpec((PAD_OUT, HIDDEN), lambda i: (0, 0)),    # w2 (padded)
            pl.BlockSpec((PAD_OUT, 1), lambda i: (0, 0)),         # b2 (padded)
        ],
        out_specs=pl.BlockSpec((tile, HIDDEN), lambda i: (i, 0)),  # row-major out tile
        compiler_params=pltpu.CompilerParams(
            dimension_semantics=("parallel",),   # shard batch tiles across TCs on v7x
            vmem_limit_bytes=32 * 1024 * 1024,
        ),
        cost_estimate=cost,
    )(x_t, w1, b1c, w2p, b2p)

    # Drop batch padding (no-op copy when N is already a tile multiple).
    return out if n_pad == n else out[:n]


def init_params(key):
    """nn.Linear-style uniform(-1/sqrt(fan_in), 1/sqrt(fan_in)) init, PyTorch layouts."""
    k1, k2, k3, k4 = jax.random.split(key, 4)
    bound1 = 1.0 / jnp.sqrt(1.0)    # fan_in = 1
    bound2 = 1.0 / jnp.sqrt(40.0)   # fan_in = 40
    w1 = jax.random.uniform(k1, (HIDDEN, 1), jnp.float32, -bound1, bound1)
    b1 = jax.random.uniform(k2, (HIDDEN,), jnp.float32, -bound1, bound1)
    w2 = jax.random.uniform(k3, (HIDDEN, HIDDEN), jnp.float32, -bound2, bound2)
    b2 = jax.random.uniform(k4, (HIDDEN,), jnp.float32, -bound2, bound2)
    return w1, b1, w2, b2


def reference_forward(x, w1, b1, w2, b2):
    # PyTorch semantics: x @ W.T + b
    h = jnp.maximum(x @ w1.T + b1, 0.0)
    return jnp.maximum(h @ w2.T + b2, 0.0)


if __name__ == "__main__":
    key = jax.random.PRNGKey(0)
    k_params, k_x1, k_x2, k_x3 = jax.random.split(key, 4)
    w1, b1, w2, b2 = init_params(k_params)

    # Small batch of scalar inputs, consistent with Feature's (N, 1) input.
    N = 8
    x = jax.random.uniform(k_x1, (N, 1), jnp.float32, -5.0, 5.0)
    out = jax.block_until_ready(feature_forward(x, w1, b1, w2, b2))
    ref = reference_forward(x, w1, b1, w2, b2)
    assert out.shape == (N, HIDDEN)
    assert jnp.allclose(out, ref, atol=1e-5, rtol=1e-5), "mismatch vs reference (N=8)"

    # Multi-tile (grid) path: 640 rows -> tile 256, 3 grid steps, padded tail sliced off.
    N2 = 640
    x2 = jax.random.uniform(k_x2, (N2, 1), jnp.float32, -5.0, 5.0)
    out2 = jax.block_until_ready(feature_forward(x2, w1, b1, w2, b2, tile_n=256))
    ref2 = reference_forward(x2, w1, b1, w2, b2)
    assert out2.shape == (N2, HIDDEN)
    assert jnp.allclose(out2, ref2, atol=1e-5, rtol=1e-5), "mismatch vs reference (N=640)"

    # Multi-chunk-within-tile path: 6400 rows -> tile 3200 (2 grid steps, >=2 chunks/tile).
    N3 = 6400
    x3 = jax.random.uniform(k_x3, (N3, 1), jnp.float32, -5.0, 5.0)
    out3 = jax.block_until_ready(feature_forward(x3, w1, b1, w2, b2))
    ref3 = reference_forward(x3, w1, b1, w2, b2)
    assert out3.shape == (N3, HIDDEN)
    assert jnp.allclose(out3, ref3, atol=1e-5, rtol=1e-5), "mismatch vs reference (N=6400)"

    print("KERNEL_OK")
</pallas_src>

<mosaic_0001>
module attributes {stable_mosaic.version = 11 : i64} {
  func.func @_feature_kernel(%arg0: i32, %arg1: memref<1x128xf32, #tpu.memory_space<vmem>>, %arg2: memref<40x1xf32, #tpu.memory_space<vmem>>, %arg3: memref<40x1xf32, #tpu.memory_space<vmem>>, %arg4: memref<128x40xf32, #tpu.memory_space<vmem>>, %arg5: memref<128x1xf32, #tpu.memory_space<vmem>>, %arg6: memref<128x40xf32, #tpu.memory_space<vmem>>) attributes {dimension_semantics = [#tpu.dimension_semantics<parallel>], iteration_bounds = array<i64: 1>, scalar_prefetch = 0 : i64, scratch_operands = 0 : i64, tpu.core_type = #tpu.core_type<tc>, window_params = [{transform_indices = @transform_0, window_bounds = array<i64: 1, 128>}, {pipeline_mode = #tpu.pipeline_mode<synchronous>, transform_indices = @transform_1, window_bounds = array<i64: 40, 1>}, {pipeline_mode = #tpu.pipeline_mode<synchronous>, transform_indices = @transform_2, window_bounds = array<i64: 40, 1>}, {pipeline_mode = #tpu.pipeline_mode<synchronous>, transform_indices = @transform_3, window_bounds = array<i64: 128, 40>}, {pipeline_mode = #tpu.pipeline_mode<synchronous>, transform_indices = @transform_4, window_bounds = array<i64: 128, 1>}, {transform_indices = @transform_5, window_bounds = array<i64: 128, 40>}]} {
    %c0 = arith.constant 0 : index
    %c0_0 = arith.constant 0 : index
    %0 = vector.load %arg1[%c0, %c0_0] : memref<1x128xf32, #tpu.memory_space<vmem>>, vector<1x128xf32>
    %c0_1 = arith.constant 0 : index
    %c0_2 = arith.constant 0 : index
    %1 = vector.load %arg2[%c0_1, %c0_2] : memref<40x1xf32, #tpu.memory_space<vmem>>, vector<40x1xf32>
    %2 = vector.broadcast %1 : vector<40x1xf32> to vector<40x128xf32>
    %3 = vector.broadcast %0 : vector<1x128xf32> to vector<40x128xf32>
    %4 = arith.mulf %2, %3 : vector<40x128xf32>
    %c0_3 = arith.constant 0 : index
    %c0_4 = arith.constant 0 : index
    %5 = vector.load %arg3[%c0_3, %c0_4] : memref<40x1xf32, #tpu.memory_space<vmem>>, vector<40x1xf32>
    %6 = vector.broadcast %5 : vector<40x1xf32> to vector<40x128xf32>
    %7 = arith.addf %4, %6 : vector<40x128xf32>
    %cst = arith.constant 0.000000e+00 : f32
    %8 = vector.broadcast %cst : f32 to vector<40x128xf32>
    %9 = arith.maximumf %7, %8 : vector<40x128xf32>
    %c0_5 = arith.constant 0 : index
    %c0_6 = arith.constant 0 : index
    %10 = vector.load %arg4[%c0_5, %c0_6] : memref<128x40xf32, #tpu.memory_space<vmem>>, vector<128x40xf32>
    %cst_7 = arith.constant dense<0.000000e+00> : vector<128x128xf32>
    %11 = tpu.matmul %10, %9, %cst_7 {dimension_numbers = #tpu.dot_dimension_numbers<[1], [0], [0], [1], [0, 0, 1, 1], [], []>} : vector<128x40xf32>, vector<40x128xf32>, vector<128x128xf32> -> vector<128x128xf32>
    %c0_8 = arith.constant 0 : index
    %c0_9 = arith.constant 0 : index
    %12 = vector.load %arg5[%c0_8, %c0_9] : memref<128x1xf32, #tpu.memory_space<vmem>>, vector<128x1xf32>
    %13 = vector.broadcast %12 : vector<128x1xf32> to vector<128x128xf32>
    %14 = arith.addf %11, %13 : vector<128x128xf32>
    %cst_10 = arith.constant 0.000000e+00 : f32
    %15 = vector.broadcast %cst_10 : f32 to vector<128x128xf32>
    %16 = arith.maximumf %14, %15 : vector<128x128xf32>
    %17 = tpu.transpose %16, [1, 0] : vector<128x128xf32> -> vector<128x128xf32>
    %18 = vector.extract_strided_slice %17 {offsets = [0, 0], sizes = [128, 40], strides = [1, 1]} : vector<128x128xf32> to vector<128x40xf32>
    %c0_11 = arith.constant 0 : index
    %c0_12 = arith.constant 0 : index
    %19 = vector.load %arg6[%c0_11, %c0_12] : memref<128x40xf32, #tpu.memory_space<vmem>>, vector<128x40xf32>
    tpu.vector_store %arg6[%c0_11, %c0_12], %18 {strides = array<i32>} : memref<128x40xf32, #tpu.memory_space<vmem>>, vector<128x40xf32>,
    return
  }
  func.func @transform_0(%arg0: i32) -> (i32, i32) {
    %c0_i32 = arith.constant 0 : i32
    %c0_i32_0 = arith.constant 0 : i32
    return %c0_i32, %arg0 : i32, i32
  }
  func.func @transform_1(%arg0: i32) -> (i32, i32) {
    %c0_i32 = arith.constant 0 : i32
    %c0_i32_0 = arith.constant 0 : i32
    %c0_i32_1 = arith.constant 0 : i32
    return %c0_i32, %c0_i32_0 : i32, i32
  }
  func.func @transform_2(%arg0: i32) -> (i32, i32) {
    %c0_i32 = arith.constant 0 : i32
    %c0_i32_0 = arith.constant 0 : i32
    %c0_i32_1 = arith.constant 0 : i32
    return %c0_i32, %c0_i32_0 : i32, i32
  }
  func.func @transform_3(%arg0: i32) -> (i32, i32) {
    %c0_i32 = arith.constant 0 : i32
    %c0_i32_0 = arith.constant 0 : i32
    %c0_i32_1 = arith.constant 0 : i32
    return %c0_i32, %c0_i32_0 : i32, i32
  }
  func.func @transform_4(%arg0: i32) -> (i32, i32) {
    %c0_i32 = arith.constant 0 : i32
    %c0_i32_0 = arith.constant 0 : i32
    %c0_i32_1 = arith.constant 0 : i32
    return %c0_i32, %c0_i32_0 : i32, i32
  }
  func.func @transform_5(%arg0: i32) -> (i32, i32) {
    %c0_i32 = arith.constant 0 : i32
    %c0_i32_0 = arith.constant 0 : i32
    return %arg0, %c0_i32 : i32, i32
  }
}

</mosaic_0001>

<bundles_post_ra>
// kernel: tpu_custom_call.1
= control target key start
LH: loop header
LB: loop body
LE: loop exit
PB: predicated region body
PF: predicated region fallthrough
CT: control target
= control target key end

     0   :  { %v565_v0 = vmov 0   ;;  %vm214_vm0 = vcmask 326656   ;;  %s805_s2 = inlined_call_operand.vmem [shape: f32[40,1], index: 2, kind: input, shape index: {}]   ;;  %s806_s1 = inlined_call_operand.vmem [shape: f32[40,1], index: 1, kind: input, shape index: {}]   ;;  %s807_s4 = inlined_call_operand.vmem [shape: f32[128,1], index: 4, kind: input, shape index: {}]   ;;  %s808_s3 = inlined_call_operand.vmem [shape: f32[128,40], index: 3, kind: input, shape index: {}]   ;;  %s809_s0 = inlined_call_operand.vmem [shape: f32[1,128], index: 0, kind: input, shape index: {}]   ;;  %s810_s5 = inlined_call_operand.vmem [shape: f32[128,40], index: 5, kind: output, shape index: {}]  }
   0x1   :  { %564 = vset.pattern.permute.xlu1 %v565_v0  ;;  %563 = vset.pattern.permute.xlu0 %v565_v0  ;;  %v62_v1 = vld [vmem:[%s805_s2] sm:$0xff]  ;;  %v63_v3 = vld [vmem:[%s805_s2 + $0x8] sm:$0xff]  ;;  %v24_v5 = vld [vmem:[%s806_s1 + $0x18] sm:$0xff] }
   0x2   :  { %v21_v2 = vld [vmem:[%s806_s1] sm:$0xff]  ;;  %69 = vperm.xlu1 %564, %v62_v1   ;;  %v22_v4 = vld [vmem:[%s806_s1 + $0x8] sm:$0xff]  ;;  %v23_v6 = vld [vmem:[%s806_s1 + $0x10] sm:$0xff] }
   0x3   :  { %28 = vperm.xlu0 %563, %v21_v2   ;;  %v65_v7 = vld [vmem:[%s805_s2 + $0x18] sm:$0xff]  ;;  %v64_v8 = vld [vmem:[%s805_s2 + $0x10] sm:$0xff]  ;;  %v66_v9 = vld [vmem:[%s805_s2 + $0x20] sm:$0xff] }
   0x4   :  { %v25_v10 = vld [vmem:[%s806_s1 + $0x20] sm:$0xff]  ;;  %v119_v11 = vld [vmem:[%s807_s4 + $0x8] sm:$0xff]  ;;  %v121_v13 = vld [vmem:[%s807_s4 + $0x18] sm:$0xff] }
   0x5   :  { %v118_v12 = vld [vmem:[%s807_s4] sm:$0xff]  ;;  %v120_v14 = vld [vmem:[%s807_s4 + $0x10] sm:$0xff]  ;;  %v123_v17 = vld [vmem:[%s807_s4 + $0x28] sm:$0xff] }
   0x6   :  { %74 = vperm.xlu1 %564, %v63_v3   ;;  %v102_v15 = vld [vmem:[%s808_s3] sm:$0xff]  ;;  %v125_v19 = vld [vmem:[%s807_s4 + $0x38] sm:$0xff]  ;;  %v124_v20 = vld [vmem:[%s807_s4 + $0x30] sm:$0xff] }
   0x7   :  { %33 = vperm.xlu0 %563, %v22_v4   ;;  %v110_v16 = vld [vmem:[%s808_s3 + $0x40] sm:$0xff]  ;;  %524 = vmatprep.mubr.msk.f32.mxu0 %vm214_vm0, %v102_v15  ;;  %v127_v21 = vld [vmem:[%s807_s4 + $0x48] sm:$0xff]  ;;  %v129_v23 = vld [vmem:[%s807_s4 + $0x58] sm:$0xff] }
   0x8   :  { %536 = vmatprep.mubr.msk.f32.mxu1 %vm214_vm0, %v110_v16  ;;  %v122_v18 = vld [vmem:[%s807_s4 + $0x20] sm:$0xff]  ;;  %v128_v24 = vld [vmem:[%s807_s4 + $0x50] sm:$0xff]  ;;  %v131_v25 = vld [vmem:[%s807_s4 + $0x68] sm:$0xff] }
   0x9   :  { %v126_v22 = vld [vmem:[%s807_s4 + $0x40] sm:$0xff]  ;;  %v133_v27 = vld [vmem:[%s807_s4 + $0x78] sm:$0xff]  ;;  %v132_v28 = vld [vmem:[%s807_s4 + $0x70] sm:$0xff] }
   0xa   :  { %43 = vperm.xlu1 %564, %v24_v5   ;;  %v130_v26 = vld [vmem:[%s807_s4 + $0x60] sm:$0xff]  ;;  %v103_v57 = vld [vmem:[%s808_s3 + $0x8] sm:$0xff]  ;;  %v104_v59 = vld [vmem:[%s808_s3 + $0x10] sm:$0xff] }
   0xb   :  { %38 = vperm.xlu0 %563, %v23_v6   ;;  %v476_v29 = vld [vmem:[%s809_s0] ss:$0 sm:$0xff]  ;;  %v111_v58 = vld [vmem:[%s808_s3 + $0x48] sm:$0xff]  ;;  %v112_v60 = vld [vmem:[%s808_s3 + $0x50] sm:$0xff] }
   0xc   :  { %v105_v61 = vld [vmem:[%s808_s3 + $0x18] sm:$0xff]  ;;  %v106_v63 = vld [vmem:[%s808_s3 + $0x20] sm:$0xff]  ;;  %v107_v1 = vld [vmem:[%s808_s3 + $0x28] sm:$0xff] }
   0xd   :  { %v113_v62 = vld [vmem:[%s808_s3 + $0x58] sm:$0xff]  ;;  %v114_v0 = vld [vmem:[%s808_s3 + $0x60] sm:$0xff]  ;;  %v115_v2 = vld [vmem:[%s808_s3 + $0x68] sm:$0xff] }
   0xe   :  { %84 = vperm.xlu1 %564, %v65_v7   ;;  %v108_v3 = vld [vmem:[%s808_s3 + $0x30] sm:$0xff]  ;;  %v109_v5 = vld [vmem:[%s808_s3 + $0x38] sm:$0xff] }
   0xf   :  { %79 = vperm.xlu0 %563, %v64_v8   ;;  %v116_v4 = vld [vmem:[%s808_s3 + $0x70] sm:$0xff]  ;;  %v117_v6 = vld [vmem:[%s808_s3 + $0x78] sm:$0xff] }
  0x12   :  { %89 = vperm.xlu1 %564, %v66_v9  }
  0x13   :  { %48 = vperm.xlu0 %563, %v25_v10  }
  0x16   :  { %141 = vperm.xlu1 %564, %v119_v11  }
  0x17   :  { %136 = vperm.xlu0 %563, %v118_v12  }
  0x1a   :  { %151 = vperm.xlu1 %564, %v121_v13  }
  0x1b   :  { %146 = vperm.xlu0 %563, %v120_v14  }
  0x1e   :  { %161 = vperm.xlu1 %564, %v123_v17  }
  0x1f   :  { %156 = vperm.xlu0 %563, %v122_v18  }
  0x22   :  { %171 = vperm.xlu1 %564, %v125_v19  }
  0x23   :  { %166 = vperm.xlu0 %563, %v124_v20  }
  0x26   :  { %181 = vperm.xlu1 %564, %v127_v21  }
  0x27   :  { %176 = vperm.xlu0 %563, %v126_v22  }
  0x2a   :  { %191 = vperm.xlu1 %564, %v129_v23  }
  0x2b   :  { %186 = vperm.xlu0 %563, %v128_v24  }
  0x2e   :  { %201 = vperm.xlu1 %564, %v131_v25  }
  0x2f   :  { %196 = vperm.xlu0 %563, %v130_v26  }
  0x32   :  { %211 = vperm.xlu1 %564, %v133_v27  }
  0x33   :  { %206 = vperm.xlu0 %563, %v132_v28  }
  0x81   :  { %v70_v30 = vpop.permute.xlu1 %69 }
  0x82   :  { %v29_v31 = vpop.permute.xlu0 %28 }
  0x83   :  { %v57_v32 = vmul.f32 %v476_v29, %v29_v31 }
  0x85   :  { %v75_v33 = vpop.permute.xlu1 %74  ;;  %v92_v35 = vadd.f32 %v70_v30, %v57_v32 }
  0x86   :  { %v34_v34 = vpop.permute.xlu0 %33 }
  0x87   :  { %v58_v36 = vmul.f32 %v476_v29, %v34_v34  ;;  %v97_v40 = vmax.f32 %v92_v35, 0.0 }
  0x89   :  { %v93_v37 = vadd.f32 %v75_v33, %v58_v36  ;;  %v44_v38 = vpop.permute.xlu1 %43 }
  0x8a   :  { %v39_v39 = vpop.permute.xlu0 %38  ;;  %v60_v43 = vmul.f32 %v476_v29, %v44_v38 }
  0x8b   :  { %v98_v41 = vmax.f32 %v93_v37, 0.0  ;;  %v59_v44 = vmul.f32 %v476_v29, %v39_v39 }
  0x8d   :  { %v548_v42 = vpack.c.bf16 %v98_v41, %v97_v40  ;;  %v85_v45 = vpop.permute.xlu1 %84 }
  0x8e   :  { %v80_v46 = vpop.permute.xlu0 %79  ;;  %v95_v47 = vadd.f32 %v85_v45, %v60_v43 }
  0x8f   :  { %v94_v48 = vadd.f32 %v80_v46, %v59_v44  ;;  %549 = vmatprep.subr.bf16.mxu0 %v548_v42  ;;  %556 = vmatprep.subr.bf16.mxu1 %v548_v42 }
  0x90   :  { %551 = vmatpush3.bf16.msra.mxu0 %v548_v42  ;;  %559 = vmatpush3.bf16.msra.mxu1 %v548_v42  ;;  %v100_v49 = vmax.f32 %v95_v47, 0.0 }
  0x91   :  { %v99_v50 = vmax.f32 %v94_v48, 0.0  ;;  %v90_v54 = vpop.permute.xlu1 %89 }
  0x92   :  { %v49_v51 = vpop.permute.xlu0 %48 }
  0x93   :  { %v552_v52 = vpack.c.bf16 %v100_v49, %v99_v50  ;;  %v61_v53 = vmul.f32 %v476_v29, %v49_v51 }
  0x95   :  { %v96_v55 = vadd.f32 %v90_v54, %v61_v53  ;;  %553 = vmatprep.subr.bf16.mxu0 %v552_v52  ;;  %557 = vmatprep.subr.bf16.mxu1 %v552_v52  ;;  %v142_v13 = vpop.permute.xlu1 %141 }
  0x96   :  { %555 = vmatpush3.bf16.msra.mxu0 %v552_v52  ;;  %560 = vmatpush3.bf16.msra.mxu1 %v552_v52  ;;  %v137_v7 = vpop.permute.xlu0 %136 }
  0x97   :  { %v101_v56 = vmax.f32 %v96_v55, 0.0 }
  0x99   :  { %522 = vmatprep.subr.mxu0 %v101_v56  ;;  %558 = vmatprep.subr.mxu1 %v101_v56  ;;  %v152_v27 = vpop.permute.xlu1 %151 }
  0x9a   :  { %523 = vmatpush3.msra.mxu0 %v101_v56  ;;  %561 = vmatpush3.msra.mxu1 %v101_v56  ;;  %v147_v20 = vpop.permute.xlu0 %146 }
  0x9b   :  { %525 = vmatmul.mubr.msk.f32.vlgmr.msra.gmra.mrb[0].mxu0 %vm214_vm0, %v103_v57  ;;  %537 = vmatmul.mubr.msk.f32.vlgmr.msra.gmra.mrb[0].mxu1 %vm214_vm0, %v111_v58 }
  0x9c   :  { %527 = vmatprep.mubr.msk.f32.mxu0 %vm214_vm0, %v104_v59  ;;  %539 = vmatprep.mubr.msk.f32.mxu1 %vm214_vm0, %v112_v60 }
  0x9d   :  { %v162_v37 = vpop.permute.xlu1 %161 }
  0x9e   :  { %v157_v34 = vpop.permute.xlu0 %156 }
  0x9f   :  { %528 = vmatmul.mubr.msk.f32.gmra.mrb[2].mxu0 %vm214_vm0, %v105_v61  ;;  %540 = vmatmul.mubr.msk.f32.gmra.mrb[2].mxu1 %vm214_vm0, %v113_v62 }
  0xa0   :  { %530 = vmatprep.mubr.msk.f32.mxu0 %vm214_vm0, %v106_v63  ;;  %542 = vmatprep.mubr.msk.f32.mxu1 %vm214_vm0, %v114_v0 }
  0xa1   :  { %v172_v43 = vpop.permute.xlu1 %171 }
  0xa2   :  { %v167_v40 = vpop.permute.xlu0 %166 }
  0xa3   :  { %531 = vmatmul.mubr.msk.f32.gmra.mrb[4].mxu0 %vm214_vm0, %v107_v1  ;;  %543 = vmatmul.mubr.msk.f32.gmra.mrb[4].mxu1 %vm214_vm0, %v115_v2 }
  0xa4   :  { %533 = vmatprep.mubr.msk.f32.mxu0 %vm214_vm0, %v108_v3  ;;  %545 = vmatprep.mubr.msk.f32.mxu1 %vm214_vm0, %v116_v4 }
  0xa5   :  { %v182_v49 = vpop.permute.xlu1 %181 }
  0xa6   :  { %v177_v46 = vpop.permute.xlu0 %176 }
  0xa7   :  { %534 = vmatmul.mubr.msk.f32.gmra.mrb[6].mxu0 %vm214_vm0, %v109_v5  ;;  %546 = vmatmul.mubr.msk.f32.gmra.mrb[6].mxu1 %vm214_vm0, %v117_v6 }
  0xa9   :  { %v192_v55 = vpop.permute.xlu1 %191 }
  0xaa   :  { %v187_v52 = vpop.permute.xlu0 %186 }
  0xad   :  { %v202_v61 = vpop.permute.xlu1 %201 }
  0xae   :  { %v197_v58 = vpop.permute.xlu0 %196 }
  0xb1   :  { %v212_v3 = vpop.permute.xlu1 %211 }
  0xb2   :  { %v207_v0 = vpop.permute.xlu0 %206 }
 0x16e   :  { %v526_v8 = vpop.f32.mrb[0].mxu0  ;;  %v538_v9 = vpop.f32.mrb[0].mxu1 }
 0x16f   :  { %v329_v10 = vpop.f32.mrb[1].mxu0  ;;  %v369_v11 = vpop.f32.mrb[1].mxu1  ;;  %v335_v14 = vadd.f32 %v526_v8, %v142_v13  ;;  %v375_v50 = vadd.f32 %v538_v9, %v182_v49 }
 0x170   :  { %v330_v12 = vadd.f32 %v329_v10, %v137_v7  ;;  %v370_v47 = vadd.f32 %v369_v11, %v177_v46 }
 0x171   :  { %v409_v21 = vmax.f32 %v335_v14, 0.0  ;;  %v417_v53 = vmax.f32 %v375_v50, 0.0 }
 0x172   :  { %v408_v15 = vmax.f32 %v330_v12, 0.0  ;;  %v529_v16 = vpop.f32.mrb[2].mxu0  ;;  %v541_v17 = vpop.f32.mrb[2].mxu1  ;;  %v416_v51 = vmax.f32 %v370_v47, 0.0 }
 0x173   :  { %v339_v18 = vpop.f32.mrb[3].mxu0  ;;  %v379_v19 = vpop.f32.mrb[3].mxu1  ;;  %v345_v28 = vadd.f32 %v529_v16, %v152_v27  ;;  %v385_v56 = vadd.f32 %v541_v17, %v192_v55 }
 0x174   :  { %424 = vxpose.xlu0.b32.start [1/16] %v408_v15, 128  ;;  %v340_v22 = vadd.f32 %v339_v18, %v147_v20  ;;  %v380_v54 = vadd.f32 %v379_v19, %v187_v52 }
 0x175   :  { %v411_v35 = vmax.f32 %v345_v28, 0.0  ;;  %v419_v59 = vmax.f32 %v385_v56, 0.0 }
 0x176   :  { %v532_v23 = vpop.f32.mrb[4].mxu0  ;;  %v544_v24 = vpop.f32.mrb[4].mxu1  ;;  %v410_v29 = vmax.f32 %v340_v22, 0.0  ;;  %v418_v57 = vmax.f32 %v380_v54, 0.0 }
 0x177   :  { %v349_v25 = vpop.f32.mrb[5].mxu0  ;;  %v389_v26 = vpop.f32.mrb[5].mxu1  ;;  %v355_v38 = vadd.f32 %v532_v23, %v162_v37  ;;  %v395_v62 = vadd.f32 %v544_v24, %v202_v61 }
 0x178   :  { %425 = vxpose.xlu0.b32.cont [2/16] %v409_v21, 128  ;;  %v350_v36 = vadd.f32 %v349_v25, %v157_v34  ;;  %v390_v60 = vadd.f32 %v389_v26, %v197_v58 }
 0x179   :  { %v413_v41 = vmax.f32 %v355_v38, 0.0  ;;  %v421_v1 = vmax.f32 %v395_v62, 0.0 }
 0x17a   :  { %v535_v30 = vpop.f32.mrb[6].mxu0  ;;  %v547_v31 = vpop.f32.mrb[6].mxu1  ;;  %v412_v39 = vmax.f32 %v350_v36, 0.0  ;;  %v420_v63 = vmax.f32 %v390_v60, 0.0 }
 0x17b   :  { %v359_v32 = vpop.f32.mrb[7].mxu0  ;;  %v399_v33 = vpop.f32.mrb[7].mxu1  ;;  %v365_v44 = vadd.f32 %v535_v30, %v172_v43  ;;  %v405_v4 = vadd.f32 %v547_v31, %v212_v3 }
 0x17c   :  { %426 = vxpose.xlu0.b32.cont [3/16] %v410_v29, 128  ;;  %v360_v42 = vadd.f32 %v359_v32, %v167_v40  ;;  %v400_v2 = vadd.f32 %v399_v33, %v207_v0 }
 0x17d   :  { %v415_v48 = vmax.f32 %v365_v44, 0.0  ;;  %v423_v6 = vmax.f32 %v405_v4, 0.0 }
 0x17e   :  { %v414_v45 = vmax.f32 %v360_v42, 0.0  ;;  %v422_v5 = vmax.f32 %v400_v2, 0.0 }
 0x180   :  { %427 = vxpose.xlu0.b32.cont [4/16] %v411_v35, 128 }
 0x184   :  { %428 = vxpose.xlu0.b32.cont [5/16] %v412_v39, 128 }
 0x188   :  { %429 = vxpose.xlu0.b32.cont [6/16] %v413_v41, 128 }
 0x18c   :  { %430 = vxpose.xlu0.b32.cont [7/16] %v414_v45, 128 }
 0x190   :  { %431 = vxpose.xlu0.b32.cont [8/16] %v415_v48, 128 }
 0x194   :  { %432 = vxpose.xlu0.b32.cont [9/16] %v416_v51, 128 }
 0x198   :  { %433 = vxpose.xlu0.b32.cont [10/16] %v417_v53, 128 }
 0x19c   :  { %434 = vxpose.xlu0.b32.cont [11/16] %v418_v57, 128 }
 0x1a0   :  { %435 = vxpose.xlu0.b32.cont [12/16] %v419_v59, 128 }
 0x1a4   :  { %436 = vxpose.xlu0.b32.cont [13/16] %v420_v63, 128 }
 0x1a8   :  { %437 = vxpose.xlu0.b32.cont [14/16] %v421_v1, 128 }
 0x1ac   :  { %438 = vxpose.xlu0.b32.cont [15/16] %v422_v5, 128 }
 0x1b0   :  { %439 = vxpose.xlu0.b32.end [16/16] %v423_v6, 128 }
 0x1f4   :  { %v440_v7 = vpop.trf.xlu0 }
 0x1f5   :  { %456 = vst.msk [vmem:[%s810_s5] sm:$0xff] %vm214_vm0, %v440_v7 }
 0x1f8   :  { %v441_v8 = vpop.trf.xlu0 }
 0x1f9   :  { %457 = vst.msk [vmem:[%s810_s5 + $0x8] sm:$0xff] %vm214_vm0, %v441_v8 }
 0x1fc   :  { %v442_v9 = vpop.trf.xlu0 }
 0x1fd   :  { %458 = vst.msk [vmem:[%s810_s5 + $0x10] sm:$0xff] %vm214_vm0, %v442_v9 }
 0x200   :  { %v443_v10 = vpop.trf.xlu0 }
 0x201   :  { %459 = vst.msk [vmem:[%s810_s5 + $0x18] sm:$0xff] %vm214_vm0, %v443_v10 }
 0x204   :  { %v444_v11 = vpop.trf.xlu0 }
 0x205   :  { %460 = vst.msk [vmem:[%s810_s5 + $0x20] sm:$0xff] %vm214_vm0, %v444_v11 }
 0x208   :  { %v445_v12 = vpop.trf.xlu0 }
 0x209   :  { %461 = vst.msk [vmem:[%s810_s5 + $0x28] sm:$0xff] %vm214_vm0, %v445_v12 }
 0x20c   :  { %v446_v13 = vpop.trf.xlu0 }
 0x20d   :  { %462 = vst.msk [vmem:[%s810_s5 + $0x30] sm:$0xff] %vm214_vm0, %v446_v13 }
 0x210   :  { %v447_v14 = vpop.trf.xlu0 }
 0x211   :  { %463 = vst.msk [vmem:[%s810_s5 + $0x38] sm:$0xff] %vm214_vm0, %v447_v14 }
 0x214   :  { %v448_v15 = vpop.trf.xlu0 }
 0x215   :  { %464 = vst.msk [vmem:[%s810_s5 + $0x40] sm:$0xff] %vm214_vm0, %v448_v15 }
 0x218   :  { %v449_v16 = vpop.trf.xlu0 }
 0x219   :  { %465 = vst.msk [vmem:[%s810_s5 + $0x48] sm:$0xff] %vm214_vm0, %v449_v16 }
 0x21c   :  { %v450_v17 = vpop.trf.xlu0 }
 0x21d   :  { %466 = vst.msk [vmem:[%s810_s5 + $0x50] sm:$0xff] %vm214_vm0, %v450_v17 }
 0x220   :  { %v451_v18 = vpop.trf.xlu0 }
 0x221   :  { %467 = vst.msk [vmem:[%s810_s5 + $0x58] sm:$0xff] %vm214_vm0, %v451_v18 }
 0x224   :  { %v452_v19 = vpop.trf.xlu0 }
 0x225   :  { %468 = vst.msk [vmem:[%s810_s5 + $0x60] sm:$0xff] %vm214_vm0, %v452_v19 }
 0x228   :  { %v453_v20 = vpop.trf.xlu0 }
 0x229   :  { %469 = vst.msk [vmem:[%s810_s5 + $0x68] sm:$0xff] %vm214_vm0, %v453_v20 }
 0x22c   :  { %v454_v21 = vpop.trf.xlu0 }
 0x22d   :  { %470 = vst.msk [vmem:[%s810_s5 + $0x70] sm:$0xff] %vm214_vm0, %v454_v21 }
 0x230   :  { %v455_v22 = vpop.trf.xlu0 }
 0x231   :  { %471 = vst.msk [vmem:[%s810_s5 + $0x78] sm:$0xff] %vm214_vm0, %v455_v22 }

</bundles_post_ra>
